<compile_context>
chip_gen: v5e
topology: v5e:2x2
jax: 0.10.0
libtpu: 0.0.40
codegen_flags: <defaults>
</compile_context>

<pallas_src>
import functools

import jax
import jax.numpy as jnp
from jax.experimental import pallas as pl
from jax.experimental.pallas import tpu as pltpu

LANES = 128


def _round_up(x, m):
    return ((x + m - 1) // m) * m


def prepare_segment_head_params(w1, b1, w2, b2, *, num_joints):
    """One-time (per model) weight preparation, outside the hot path.

    w1: (C, H), b1: (H,) or (1, H), w2: (H, 2), b2: (2,) or (1, 2).
    Returns (w1_p (K, Hp), b1_p (1, Hp), w2_p (Hp, 2), b2_p (1, 2)) with the
    joint mean folded into w1 and the hidden dim zero-padded to 128 lanes.
    """
    C, H = w1.shape
    K = num_joints * C
    Hp = _round_up(max(H, LANES), LANES)

    # Fold mean over joints into the first matmul (row-major (J, C) fold).
    w1_folded = jnp.tile(w1.astype(jnp.float32), (num_joints, 1)) / jnp.float32(num_joints)

    w1_p = jnp.zeros((K, Hp), jnp.float32).at[:, :H].set(w1_folded)
    b1_p = jnp.zeros((1, Hp), jnp.float32).at[:, :H].set(
        jnp.reshape(b1, (1, H)).astype(jnp.float32))
    w2_p = jnp.zeros((Hp, 2), jnp.float32).at[:H, :].set(w2.astype(jnp.float32))
    b2_p = jnp.reshape(b2, (1, 2)).astype(jnp.float32)
    return w1_p, b1_p, w2_p, b2_p


def _segment_head_kernel(x_ref, w1_ref, b1_ref, w2_ref, b2_ref, o_ref):
    # x_ref : (tr, K)     w1_ref: (K, Hp)   b1_ref: (1, Hp)
    # w2_ref: (Hp, 2)     b2_ref: (1, 2)    o_ref : (tr, 2)
    x = x_ref[...]

    # Linear(in_size -> hidden) with the joint mean folded into w1, + ReLU.
    h = jnp.dot(x, w1_ref[...], preferred_element_type=jnp.float32)
    h = jnp.maximum(h + b1_ref[...], 0.0)

    # Linear(hidden -> 2); narrow output (no lane padding).
    o = jnp.dot(h, w2_ref[...], preferred_element_type=jnp.float32) + b2_ref[...]

    o_ref[...] = o.astype(o_ref.dtype)


@functools.partial(jax.jit, static_argnames=("block_rows",))
def segment_head_forward(x, w1_p, b1_p, w2_p, b2_p, *, block_rows=2048):
    """x: (N, T, J, C).  w1_p/b1_p/w2_p/b2_p from prepare_segment_head_params.
    Returns (N, T, 2)."""
    N, T, J, C = x.shape
    R = N * T
    K = J * C
    Hp = w1_p.shape[1]
    assert w1_p.shape == (K, Hp), (w1_p.shape, K, Hp)

    # Free row-major collapse: (N, T, J, C) -> (R, K).
    x_flat = x.reshape(R, K)

    # --- row tile selection -------------------------------------------------
    # Aim for ~8 grid steps (keeps the "parallel" axis shardable across v7x's
    # 2 TensorCores and the pipeline busy), but keep tiles >= 256 rows so DMAs
    # amortize the ~0.35 us per-step overhead, capped at block_rows.
    block_rows = max(8, _round_up(block_rows, 8))
    tr = _round_up(pl.cdiv(R, 8), 8)
    tr = min(max(tr, 256), block_rows)
    if tr >= R:
        tr = R  # single full-extent block: always a legal block shape
    grid = (pl.cdiv(R, tr),)  # partial last block is clipped by Pallas

    # --- VMEM budget (double-buffered streams + resident weights) -----------
    vmem_needed = (
        2 * tr * K * 4                      # x tiles (double-buffered)
        + 2 * tr * LANES * 4                # output tiles (lane-tile padded, conservative)
        + 2 * (K * Hp + Hp + Hp * LANES + LANES) * 4  # weights/bias (conservative)
    )
    vmem_limit = int(min(max(vmem_needed + (4 << 20), 8 << 20), 48 << 20))

    cost = pl.CostEstimate(
        flops=2 * R * (K * Hp + Hp * 2),
        transcendentals=0,
        bytes_accessed=(R * K + R * 2 + K * Hp + Hp + Hp * 2 + 2) * 4,
    )

    out = pl.pallas_call(
        _segment_head_kernel,
        out_shape=jax.ShapeDtypeStruct((R, 2), x.dtype),
        grid=grid,
        in_specs=[
            pl.BlockSpec((tr, K), lambda i: (i, 0)),    # x tile (streams)
            pl.BlockSpec((K, Hp), lambda i: (0, 0)),    # w1 (VMEM-resident)
            pl.BlockSpec((1, Hp), lambda i: (0, 0)),    # b1 (VMEM-resident)
            pl.BlockSpec((Hp, 2), lambda i: (0, 0)),    # w2 (VMEM-resident)
            pl.BlockSpec((1, 2), lambda i: (0, 0)),     # b2 (VMEM-resident)
        ],
        out_specs=pl.BlockSpec((tr, 2), lambda i: (i, 0)),
        compiler_params=pltpu.CompilerParams(
            dimension_semantics=("parallel",),
            vmem_limit_bytes=vmem_limit,
        ),
        cost_estimate=cost,
    )(x_flat, w1_p, b1_p, w2_p, b2_p)

    return out.reshape(N, T, 2)


def _reference(x, w1, b1, w2, b2):
    xm = jnp.mean(x, axis=2)
    h = jnp.maximum(xm @ w1 + jnp.reshape(b1, (1, -1)), 0.0)
    return h @ w2 + jnp.reshape(b2, (1, -1))


if __name__ == "__main__":
    # Small shapes consistent with the module's forward: (N, T, J, C).
    N, T, J, C = 2, 8, 4, 32
    HIDDEN = 32

    key = jax.random.PRNGKey(0)
    kx, k1, kb1, k2, kb2, kx2 = jax.random.split(key, 6)

    x = jax.random.normal(kx, (N, T, J, C), dtype=jnp.float32)

    # Deterministic parameter init (uniform, roughly PyTorch Linear scale).
    bound1 = 1.0 / (C ** 0.5)
    w1 = jax.random.uniform(k1, (C, HIDDEN), jnp.float32, -bound1, bound1)
    b1 = jax.random.uniform(kb1, (HIDDEN,), jnp.float32, -bound1, bound1)
    bound2 = 1.0 / (HIDDEN ** 0.5)
    w2 = jax.random.uniform(k2, (HIDDEN, 2), jnp.float32, -bound2, bound2)
    b2 = jax.random.uniform(kb2, (2,), jnp.float32, -bound2, bound2)

    # One-time weight preparation (outside the per-call hot path).
    params = prepare_segment_head_params(w1, b1, w2, b2, num_joints=J)

    out = segment_head_forward(x, *params)
    out = jax.block_until_ready(out)
    ref = _reference(x, w1, b1, w2, b2)
    assert out.shape == (N, T, 2), out.shape
    assert jnp.allclose(out, ref, atol=1e-5, rtol=1e-5), "mismatch vs reference"

    # Second check: rows not a multiple of the tile -> exercises the clipped
    # partial boundary block (out-of-bounds input rows must not leak into any
    # valid output row).
    N2, T2 = 2, 13  # R = 26, forced tile of 8 -> 4 grid steps, last one partial
    x2 = jax.random.normal(kx2, (N2, T2, J, C), dtype=jnp.float32)
    out2 = jax.block_until_ready(segment_head_forward(x2, *params, block_rows=8))
    ref2 = _reference(x2, w1, b1, w2, b2)
    assert out2.shape == (N2, T2, 2), out2.shape
    assert jnp.allclose(out2, ref2, atol=1e-5, rtol=1e-5), "mismatch on partial-block path"

    print("KERNEL_OK")
</pallas_src>

<mosaic_0001>
module attributes {stable_mosaic.version = 11 : i64} {
  func.func @_segment_head_kernel(%arg0: i32, %arg1: memref<16x128xf32, #tpu.memory_space<vmem>>, %arg2: memref<128x128xf32, #tpu.memory_space<vmem>>, %arg3: memref<1x128xf32, #tpu.memory_space<vmem>>, %arg4: memref<128x2xf32, #tpu.memory_space<vmem>>, %arg5: memref<1x2xf32, #tpu.memory_space<vmem>>, %arg6: memref<16x2xf32, #tpu.memory_space<vmem>>) attributes {dimension_semantics = [#tpu.dimension_semantics<parallel>], iteration_bounds = array<i64: 1>, scalar_prefetch = 0 : i64, scratch_operands = 0 : i64, tpu.core_type = #tpu.core_type<tc>, window_params = [{transform_indices = @transform_0, window_bounds = array<i64: 16, 128>}, {pipeline_mode = #tpu.pipeline_mode<synchronous>, transform_indices = @transform_1, window_bounds = array<i64: 128, 128>}, {pipeline_mode = #tpu.pipeline_mode<synchronous>, transform_indices = @transform_2, window_bounds = array<i64: 1, 128>}, {pipeline_mode = #tpu.pipeline_mode<synchronous>, transform_indices = @transform_3, window_bounds = array<i64: 128, 2>}, {pipeline_mode = #tpu.pipeline_mode<synchronous>, transform_indices = @transform_4, window_bounds = array<i64: 1, 2>}, {transform_indices = @transform_5, window_bounds = array<i64: 16, 2>}]} {
    %c0 = arith.constant 0 : index
    %c0_0 = arith.constant 0 : index
    %0 = vector.load %arg1[%c0, %c0_0] : memref<16x128xf32, #tpu.memory_space<vmem>>, vector<16x128xf32>
    %c0_1 = arith.constant 0 : index
    %c0_2 = arith.constant 0 : index
    %1 = vector.load %arg2[%c0_1, %c0_2] : memref<128x128xf32, #tpu.memory_space<vmem>>, vector<128x128xf32>
    %cst = arith.constant dense<0.000000e+00> : vector<16x128xf32>
    %2 = tpu.matmul %0, %1, %cst {dimension_numbers = #tpu.dot_dimension_numbers<[1], [0], [0], [1], [0, 0, 1, 1], [], []>} : vector<16x128xf32>, vector<128x128xf32>, vector<16x128xf32> -> vector<16x128xf32>
    %c0_3 = arith.constant 0 : index
    %c0_4 = arith.constant 0 : index
    %3 = vector.load %arg3[%c0_3, %c0_4] : memref<1x128xf32, #tpu.memory_space<vmem>>, vector<1x128xf32>
    %4 = vector.broadcast %3 : vector<1x128xf32> to vector<16x128xf32>
    %5 = arith.addf %2, %4 : vector<16x128xf32>
    %cst_5 = arith.constant 0.000000e+00 : f32
    %6 = vector.broadcast %cst_5 : f32 to vector<16x128xf32>
    %7 = arith.maximumf %5, %6 : vector<16x128xf32>
    %c0_6 = arith.constant 0 : index
    %c0_7 = arith.constant 0 : index
    %8 = vector.load %arg4[%c0_6, %c0_7] : memref<128x2xf32, #tpu.memory_space<vmem>>, vector<128x2xf32>
    %cst_8 = arith.constant dense<0.000000e+00> : vector<16x2xf32>
    %9 = tpu.matmul %7, %8, %cst_8 {dimension_numbers = #tpu.dot_dimension_numbers<[1], [0], [0], [1], [0, 0, 1, 1], [], []>} : vector<16x128xf32>, vector<128x2xf32>, vector<16x2xf32> -> vector<16x2xf32>
    %c0_9 = arith.constant 0 : index
    %c0_10 = arith.constant 0 : index
    %10 = vector.load %arg5[%c0_9, %c0_10] : memref<1x2xf32, #tpu.memory_space<vmem>>, vector<1x2xf32>
    %11 = vector.broadcast %10 : vector<1x2xf32> to vector<16x2xf32>
    %12 = arith.addf %9, %11 : vector<16x2xf32>
    %c0_11 = arith.constant 0 : index
    %c0_12 = arith.constant 0 : index
    %13 = vector.load %arg6[%c0_11, %c0_12] : memref<16x2xf32, #tpu.memory_space<vmem>>, vector<16x2xf32>
    tpu.vector_store %arg6[%c0_11, %c0_12], %12 {strides = array<i32>} : memref<16x2xf32, #tpu.memory_space<vmem>>, vector<16x2xf32>,
    return
  }
  func.func @transform_0(%arg0: i32) -> (i32, i32) {
    %c0_i32 = arith.constant 0 : i32
    %c0_i32_0 = arith.constant 0 : i32
    return %arg0, %c0_i32 : i32, i32
  }
  func.func @transform_1(%arg0: i32) -> (i32, i32) {
    %c0_i32 = arith.constant 0 : i32
    %c0_i32_0 = arith.constant 0 : i32
    %c0_i32_1 = arith.constant 0 : i32
    return %c0_i32, %c0_i32_0 : i32, i32
  }
  func.func @transform_2(%arg0: i32) -> (i32, i32) {
    %c0_i32 = arith.constant 0 : i32
    %c0_i32_0 = arith.constant 0 : i32
    %c0_i32_1 = arith.constant 0 : i32
    return %c0_i32, %c0_i32_0 : i32, i32
  }
  func.func @transform_3(%arg0: i32) -> (i32, i32) {
    %c0_i32 = arith.constant 0 : i32
    %c0_i32_0 = arith.constant 0 : i32
    %c0_i32_1 = arith.constant 0 : i32
    return %c0_i32, %c0_i32_0 : i32, i32
  }
  func.func @transform_4(%arg0: i32) -> (i32, i32) {
    %c0_i32 = arith.constant 0 : i32
    %c0_i32_0 = arith.constant 0 : i32
    %c0_i32_1 = arith.constant 0 : i32
    return %c0_i32, %c0_i32_0 : i32, i32
  }
  func.func @transform_5(%arg0: i32) -> (i32, i32) {
    %c0_i32 = arith.constant 0 : i32
    %c0_i32_0 = arith.constant 0 : i32
    return %arg0, %c0_i32 : i32, i32
  }
}

</mosaic_0001>

<bundles_post_ra>
// kernel: segment_head_forward.1
= control target key start
LH: loop header
LB: loop body
LE: loop exit
PB: predicated region body
PF: predicated region fallthrough
CT: control target
= control target key end

     0   :  { %vm110_vm0 = vcmask 15360   ;;  %s295_s1 = inlined_call_operand.vmem [shape: f32[128,128], index: 1, kind: input, shape index: {}]   ;;  %s296_s3 = inlined_call_operand.vmem [shape: f32[128,2], index: 3, kind: input, shape index: {}]   ;;  %s297_s2 = inlined_call_operand.vmem [shape: f32[1,128], index: 2, kind: input, shape index: {}]   ;;  %s298_s0 = inlined_call_operand.vmem [shape: f32[16,128], index: 0, kind: input, shape index: {}]   ;;  %s299_s4 = inlined_call_operand.vmem [shape: f32[1,2], index: 4, kind: input, shape index: {}]   ;;  %s300_s5 = inlined_call_operand.vmem [shape: f32[16,2], index: 5, kind: output, shape index: {}]  }
   0x1   :  { %v37_v0 = vld [vmem:[%s295_s1 + $0x78] sm:$0xff]  ;;  %v36_v1 = vld [vmem:[%s295_s1 + $0x70] sm:$0xff]  ;;  %v35_v2 = vld [vmem:[%s295_s1 + $0x68] sm:$0xff] }
   0x2   :  { %117 = vmatpush.msra.mxu2 %v37_v0  ;;  %42 = vmatpush.msra.mxu0 %v37_v0  ;;  %v34_v3 = vld [vmem:[%s295_s1 + $0x60] sm:$0xff]  ;;  %v33_v4 = vld [vmem:[%s295_s1 + $0x58] sm:$0xff]  ;;  %v81_v6 = vld [vmem:[%s296_s3 + $0x70] sm:$0xff] }
   0x3   :  { %v82_v5 = vld [vmem:[%s296_s3 + $0x78] sm:$0xff]  ;;  %v32_v7 = vld [vmem:[%s295_s1 + $0x50] sm:$0xff]  ;;  %v80_v8 = vld [vmem:[%s296_s3 + $0x68] sm:$0xff] }
   0x4   :  { %118 = vmatpush.msra.mxu2 %v36_v1  ;;  %43 = vmatpush.msra.mxu0 %v36_v1  ;;  %v31_v9 = vld [vmem:[%s295_s1 + $0x48] sm:$0xff]  ;;  %v79_v10 = vld [vmem:[%s296_s3 + $0x60] sm:$0xff]  ;;  %v78_v12 = vld [vmem:[%s296_s3 + $0x58] sm:$0xff] }
   0x5   :  { %133 = vmatpush.msra.mxu3 %v82_v5  ;;  %87 = vmatpush.msra.mxu1 %v82_v5  ;;  %v30_v11 = vld [vmem:[%s295_s1 + $0x40] sm:$0xff]  ;;  %v29_v13 = vld [vmem:[%s295_s1 + $0x38] sm:$0xff]  ;;  %v77_v14 = vld [vmem:[%s296_s3 + $0x50] sm:$0xff] }
   0x6   :  { %119 = vmatpush.msra.mxu2 %v35_v2  ;;  %44 = vmatpush.msra.mxu0 %v35_v2  ;;  %v28_v15 = vld [vmem:[%s295_s1 + $0x30] sm:$0xff]  ;;  %v76_v16 = vld [vmem:[%s296_s3 + $0x48] sm:$0xff]  ;;  %v75_v18 = vld [vmem:[%s296_s3 + $0x40] sm:$0xff] }
   0x7   :  { %134 = vmatpush.msra.mxu3 %v81_v6  ;;  %88 = vmatpush.msra.mxu1 %v81_v6  ;;  %v27_v17 = vld [vmem:[%s295_s1 + $0x28] sm:$0xff]  ;;  %v26_v19 = vld [vmem:[%s295_s1 + $0x20] sm:$0xff]  ;;  %v74_v20 = vld [vmem:[%s296_s3 + $0x38] sm:$0xff] }
   0x8   :  { %120 = vmatpush.msra.mxu2 %v34_v3  ;;  %45 = vmatpush.msra.mxu0 %v34_v3  ;;  %v25_v21 = vld [vmem:[%s295_s1 + $0x18] sm:$0xff]  ;;  %v73_v22 = vld [vmem:[%s296_s3 + $0x30] sm:$0xff]  ;;  %v72_v24 = vld [vmem:[%s296_s3 + $0x28] sm:$0xff] }
   0x9   :  { %135 = vmatpush.msra.mxu3 %v80_v8  ;;  %89 = vmatpush.msra.mxu1 %v80_v8  ;;  %v24_v23 = vld [vmem:[%s295_s1 + $0x10] sm:$0xff]  ;;  %v23_v25 = vld [vmem:[%s295_s1 + $0x8] sm:$0xff]  ;;  %v71_v26 = vld [vmem:[%s296_s3 + $0x20] sm:$0xff] }
   0xa   :  { %121 = vmatpush.msra.mxu2 %v33_v4  ;;  %46 = vmatpush.msra.mxu0 %v33_v4  ;;  %v22_v27 = vld [vmem:[%s295_s1] sm:$0xff]  ;;  %v21_v28 = vld [vmem:[%s298_s0 + $0x8] sm:$0xff]  ;;  %v70_v30 = vld [vmem:[%s296_s3 + $0x18] sm:$0xff] }
   0xb   :  { %136 = vmatpush.msra.mxu3 %v79_v10  ;;  %90 = vmatpush.msra.mxu1 %v79_v10  ;;  %v20_v29 = vld [vmem:[%s298_s0] sm:$0xff]  ;;  %v69_v31 = vld [vmem:[%s296_s3 + $0x10] sm:$0xff]  ;;  %v68_v32 = vld [vmem:[%s296_s3 + $0x8] sm:$0xff] }
   0xc   :  { %122 = vmatpush.msra.mxu2 %v32_v7  ;;  %47 = vmatpush.msra.mxu0 %v32_v7  ;;  %v67_v33 = vld [vmem:[%s296_s3] sm:$0xff] }
   0xd   :  { %137 = vmatpush.msra.mxu3 %v78_v12  ;;  %91 = vmatpush.msra.mxu1 %v78_v12  ;;  %v149_v34 = vld [vmem:[%s297_s2] ss:$0 sm:$0xff] }
   0xe   :  { %123 = vmatpush.msra.mxu2 %v31_v9  ;;  %48 = vmatpush.msra.mxu0 %v31_v9  ;;  %v150_v41 = vld [vmem:[%s299_s4] ss:$0 sm:$0xff] }
   0xf   :  { %138 = vmatpush.msra.mxu3 %v77_v14  ;;  %92 = vmatpush.msra.mxu1 %v77_v14 }
  0x10   :  { %124 = vmatpush.msra.mxu2 %v30_v11  ;;  %49 = vmatpush.msra.mxu0 %v30_v11 }
  0x11   :  { %139 = vmatpush.msra.mxu3 %v76_v16  ;;  %93 = vmatpush.msra.mxu1 %v76_v16 }
  0x12   :  { %125 = vmatpush.msra.mxu2 %v29_v13  ;;  %50 = vmatpush.msra.mxu0 %v29_v13 }
  0x13   :  { %140 = vmatpush.msra.mxu3 %v75_v18  ;;  %94 = vmatpush.msra.mxu1 %v75_v18 }
  0x14   :  { %126 = vmatpush.msra.mxu2 %v28_v15  ;;  %51 = vmatpush.msra.mxu0 %v28_v15 }
  0x15   :  { %141 = vmatpush.msra.mxu3 %v74_v20  ;;  %95 = vmatpush.msra.mxu1 %v74_v20 }
  0x16   :  { %127 = vmatpush.msra.mxu2 %v27_v17  ;;  %52 = vmatpush.msra.mxu0 %v27_v17 }
  0x17   :  { %142 = vmatpush.msra.mxu3 %v73_v22  ;;  %96 = vmatpush.msra.mxu1 %v73_v22 }
  0x18   :  { %128 = vmatpush.msra.mxu2 %v26_v19  ;;  %53 = vmatpush.msra.mxu0 %v26_v19 }
  0x19   :  { %143 = vmatpush.msra.mxu3 %v72_v24  ;;  %97 = vmatpush.msra.mxu1 %v72_v24 }
  0x1a   :  { %129 = vmatpush.msra.mxu2 %v25_v21  ;;  %54 = vmatpush.msra.mxu0 %v25_v21 }
  0x1b   :  { %144 = vmatpush.msra.mxu3 %v71_v26  ;;  %98 = vmatpush.msra.mxu1 %v71_v26 }
  0x1c   :  { %130 = vmatpush.msra.mxu2 %v24_v23  ;;  %55 = vmatpush.msra.mxu0 %v24_v23 }
  0x1d   :  { %145 = vmatpush.msra.mxu3 %v70_v30  ;;  %99 = vmatpush.msra.mxu1 %v70_v30 }
  0x1e   :  { %131 = vmatpush.msra.mxu2 %v23_v25  ;;  %56 = vmatpush.msra.mxu0 %v23_v25 }
  0x1f   :  { %146 = vmatpush.msra.mxu3 %v69_v31  ;;  %100 = vmatpush.msra.mxu1 %v69_v31 }
  0x20   :  { %132 = vmatpush.msra.mxu2 %v22_v27  ;;  %57 = vmatpush.msra.mxu0 %v22_v27 }
  0x21   :  { %61 = vmatmul.f32.vlgmr.msra.gmra.mxu2 %v21_v28  ;;  %58 = vmatmul.f32.vlgmr.msra.gmra.mxu0 %v20_v29 }
  0x22   :  { %147 = vmatpush.msra.mxu3 %v68_v32  ;;  %101 = vmatpush.msra.mxu1 %v68_v32 }
  0x24   :  { %148 = vmatpush.msra.mxu3 %v67_v33  ;;  %102 = vmatpush.msra.mxu1 %v67_v33 }
  0x9e   :  { %v59_v35 = vpop.f32.mrf.mxu0 }
  0x9f   :  { %v60_v36 = vadd.f32 %v149_v34, %v59_v35 }
  0xa1   :  { %v65_v37 = vmax.f32 %v60_v36, 0.0 }
  0xa3   :  { %103 = vmatmul.f32.vlgmr.msra.gmra.mxu1 %v65_v37 }
  0xa4   :  { %v62_v38 = vpop.f32.mrf.mxu2 }
  0xa5   :  { %v63_v39 = vadd.f32 %v149_v34, %v62_v38 }
  0xa7   :  { %v66_v40 = vmax.f32 %v63_v39, 0.0 }
  0xa9   :  { %106 = vmatmul.f32.vlgmr.msra.gmra.mxu3 %v66_v40 }
 0x120   :  { %v104_v42 = vpop.f32.mrf.mxu1 }
 0x121   :  { %v105_v43 = vadd.f32 %v150_v41, %v104_v42 }
 0x123   :  { %111 = vst.msk [vmem:[%s300_s5] sm:$0xff] %vm110_vm0, %v105_v43 }
 0x12c   :  { %v107_v44 = vpop.f32.mrf.mxu3 }
 0x12d   :  { %v108_v45 = vadd.f32 %v150_v41, %v107_v44 }
 0x12f   :  { %112 = vst.msk [vmem:[%s300_s5 + $0x8] sm:$0xff] %vm110_vm0, %v108_v45 }

</bundles_post_ra>
